<compile_context>
chip_gen: v7x
topology: tpu7x:2x2x1
jax: 0.10.0
libtpu: 0.0.40
codegen_flags: <defaults>
</compile_context>

<pallas_src>
import functools

import jax
import jax.numpy as jnp
import numpy as np
from jax.experimental import pallas as pl
from jax.experimental.pallas import tpu as pltpu


def _lstm_kernel(x_ref, h0_ref, c0_ref, wih_t_ref, whh_t_ref, b_ref,
                 wlin_t_ref, blin_ref, out_ref, h_out_ref, c_out_ref,
                 *, seq_len, batch, hidden):
    # Hoisted input projection: one (T*B, I) @ (I, 4H) MXU push covering every
    # timestep, bias folded.  Kept entirely in vregs (no VMEM scratch).
    xw = (jnp.dot(x_ref[...], wih_t_ref[...],
                  preferred_element_type=jnp.float32)
          + b_ref[...])                              # (T*B, 4H)

    whh_t = whh_t_ref[...]                           # (H, 4H), loaded once
    h = h0_ref[...]                                  # (B, H)
    c = c0_ref[...]                                  # (B, H)

    # Fully unrolled recurrence: t is a Python int, so both the xW slice and
    # the gate slices are static.  vreg pressure is tiny at these shapes.
    for t in range(seq_len):
        gates = xw[t * batch:(t + 1) * batch, :] + jnp.dot(
            h, whh_t, preferred_element_type=jnp.float32)   # (B, 4H)

        # Two full-row EUP pushes instead of four quarter-row ones.
        sig = jax.nn.sigmoid(gates)
        th = jnp.tanh(gates)

        i_g = sig[:, 0 * hidden:1 * hidden]
        f_g = sig[:, 1 * hidden:2 * hidden]
        g_g = th[:, 2 * hidden:3 * hidden]
        o_g = sig[:, 3 * hidden:4 * hidden]

        c = f_g * c + i_g * g_g
        h = o_g * jnp.tanh(c)

    # Final Linear on the last hidden state == predictions[-1].
    out_ref[...] = (jnp.dot(h, wlin_t_ref[...],
                            preferred_element_type=jnp.float32)
                    + blin_ref[...]).astype(out_ref.dtype)
    h_out_ref[...] = h
    c_out_ref[...] = c


def lstm_forward(x, h0, c0, params):
    """One forward() call.

    x:  (T, B, I) float32, time-major.  Each batch element is an independent
        sequence (B=1 matches the PyTorch module exactly).
    h0, c0: (B, H) carried hidden state (self.hidden_cell).
    Returns (pred (B, O), h_T (B, H), c_T (B, H)).
    """
    wih_t, whh_t, b, wlin_t, blin = params
    T, B, I = x.shape
    H = whh_t.shape[0]
    O = wlin_t.shape[1]

    kernel = functools.partial(_lstm_kernel, seq_len=T, batch=B, hidden=H)
    vmem = pl.BlockSpec(memory_space=pltpu.MemorySpace.VMEM)

    flops = 2 * T * B * I * (4 * H) + 2 * T * B * H * (4 * H) + 2 * B * H * O
    transcendentals = T * B * (9 * H)          # sigmoid(4H) + tanh(4H) + tanh(H)
    bytes_accessed = 4 * (T * B * I + 2 * B * H            # x, h0, c0
                          + I * 4 * H + H * 4 * H + 4 * H  # weights + bias
                          + H * O + O                      # linear
                          + B * O + 2 * B * H)             # outputs

    pred, h_n, c_n = pl.pallas_call(
        kernel,
        out_shape=(jax.ShapeDtypeStruct((B, O), jnp.float32),
                   jax.ShapeDtypeStruct((B, H), jnp.float32),
                   jax.ShapeDtypeStruct((B, H), jnp.float32)),
        in_specs=[vmem] * 8,
        out_specs=(vmem, vmem, vmem),
        cost_estimate=pl.CostEstimate(flops=flops,
                                      transcendentals=transcendentals,
                                      bytes_accessed=bytes_accessed),
    )(x.reshape(T * B, I), h0, c0, wih_t, whh_t, b, wlin_t, blin)
    return pred, h_n, c_n


def lstm_reference(x, h0, c0, params):
    """Pure-JAX reference matching PyTorch nn.LSTM + nn.Linear semantics."""
    wih_t, whh_t, b, wlin_t, blin = params
    H = whh_t.shape[0]

    def step(carry, x_t):
        h, c = carry
        gates = x_t @ wih_t + h @ whh_t + b
        i = jax.nn.sigmoid(gates[:, 0 * H:1 * H])
        f = jax.nn.sigmoid(gates[:, 1 * H:2 * H])
        g = jnp.tanh(gates[:, 2 * H:3 * H])
        o = jax.nn.sigmoid(gates[:, 3 * H:4 * H])
        c = f * c + i * g
        h = o * jnp.tanh(c)
        return (h, c), None

    (h_last, c_last), _ = jax.lax.scan(step, (h0, c0), x)
    return h_last @ wlin_t + blin, h_last, c_last


def init_params(key, input_size, hidden_size, output_size):
    """Deterministic synthetic parameters (PyTorch-style uniform init)."""
    k = jax.random.split(key, 6)
    s = 1.0 / np.sqrt(hidden_size)
    wih = jax.random.uniform(k[0], (4 * hidden_size, input_size), jnp.float32, -s, s)
    whh = jax.random.uniform(k[1], (4 * hidden_size, hidden_size), jnp.float32, -s, s)
    bih = jax.random.uniform(k[2], (4 * hidden_size,), jnp.float32, -s, s)
    bhh = jax.random.uniform(k[3], (4 * hidden_size,), jnp.float32, -s, s)
    wlin = jax.random.uniform(k[4], (output_size, hidden_size), jnp.float32, -s, s)
    blin = jax.random.uniform(k[5], (output_size,), jnp.float32, -s, s)
    # Pre-transpose + fold biases for the kernel hot path.
    return (wih.T, whh.T, (bih + bhh)[None, :], wlin.T, blin[None, :])


if __name__ == "__main__":
    # Small shapes consistent with the module: seq=8, hidden=32; 8 independent
    # sequences fill one f32 sublane tile (the module itself is batch=1).
    SEQ, BATCH, INPUT, HIDDEN, OUTPUT = 8, 8, 16, 32, 16

    key = jax.random.PRNGKey(0)
    kx1, kx2, kp = jax.random.split(key, 3)
    x1 = jax.random.normal(kx1, (SEQ, BATCH, INPUT), jnp.float32)
    x2 = jax.random.normal(kx2, (SEQ, BATCH, INPUT), jnp.float32)
    params = init_params(kp, INPUT, HIDDEN, OUTPUT)

    h0 = jnp.zeros((BATCH, HIDDEN), jnp.float32)
    c0 = jnp.zeros((BATCH, HIDDEN), jnp.float32)

    # First forward() call (zero state, as set in the module constructor),
    # then a second call carrying self.hidden_cell exactly like PyTorch.
    pred1, h1, c1 = lstm_forward(x1, h0, c0, params)
    pred2, h2, c2 = lstm_forward(x2, h1, c1, params)
    jax.block_until_ready((pred1, pred2, h2, c2))

    ref1, rh1, rc1 = lstm_reference(x1, h0, c0, params)
    ref2, rh2, rc2 = lstm_reference(x2, rh1, rc1, params)

    np.testing.assert_allclose(np.asarray(pred1), np.asarray(ref1), rtol=1e-5, atol=1e-5)
    np.testing.assert_allclose(np.asarray(pred2), np.asarray(ref2), rtol=1e-5, atol=1e-5)
    np.testing.assert_allclose(np.asarray(h2), np.asarray(rh2), rtol=1e-5, atol=1e-5)
    np.testing.assert_allclose(np.asarray(c2), np.asarray(rc2), rtol=1e-5, atol=1e-5)
    print("KERNEL_OK")
</pallas_src>

<mosaic_0001>
module attributes {stable_mosaic.version = 11 : i64} {
  func.func @_lstm_kernel(%arg0: memref<64x16xf32, #tpu.memory_space<vmem>>, %arg1: memref<8x32xf32, #tpu.memory_space<vmem>>, %arg2: memref<8x32xf32, #tpu.memory_space<vmem>>, %arg3: memref<16x128xf32, #tpu.memory_space<vmem>>, %arg4: memref<32x128xf32, #tpu.memory_space<vmem>>, %arg5: memref<1x128xf32, #tpu.memory_space<vmem>>, %arg6: memref<32x16xf32, #tpu.memory_space<vmem>>, %arg7: memref<1x16xf32, #tpu.memory_space<vmem>>, %arg8: memref<8x16xf32, #tpu.memory_space<vmem>>, %arg9: memref<8x32xf32, #tpu.memory_space<vmem>>, %arg10: memref<8x32xf32, #tpu.memory_space<vmem>>) attributes {dimension_semantics = [], scalar_prefetch = 0 : i64, scratch_operands = 0 : i64, tpu.core_type = #tpu.core_type<tc>} {
    %c0 = arith.constant 0 : index
    %c0_0 = arith.constant 0 : index
    %0 = vector.load %arg0[%c0, %c0_0] : memref<64x16xf32, #tpu.memory_space<vmem>>, vector<64x16xf32>
    %c0_1 = arith.constant 0 : index
    %c0_2 = arith.constant 0 : index
    %1 = vector.load %arg3[%c0_1, %c0_2] : memref<16x128xf32, #tpu.memory_space<vmem>>, vector<16x128xf32>
    %cst = arith.constant dense<0.000000e+00> : vector<64x128xf32>
    %2 = tpu.matmul %0, %1, %cst {dimension_numbers = #tpu.dot_dimension_numbers<[1], [0], [0], [1], [0, 0, 1, 1], [], []>} : vector<64x16xf32>, vector<16x128xf32>, vector<64x128xf32> -> vector<64x128xf32>
    %c0_3 = arith.constant 0 : index
    %c0_4 = arith.constant 0 : index
    %3 = vector.load %arg5[%c0_3, %c0_4] : memref<1x128xf32, #tpu.memory_space<vmem>>, vector<1x128xf32>
    %4 = vector.broadcast %3 : vector<1x128xf32> to vector<64x128xf32>
    %5 = arith.addf %2, %4 : vector<64x128xf32>
    %c0_5 = arith.constant 0 : index
    %c0_6 = arith.constant 0 : index
    %6 = vector.load %arg4[%c0_5, %c0_6] : memref<32x128xf32, #tpu.memory_space<vmem>>, vector<32x128xf32>
    %c0_7 = arith.constant 0 : index
    %c0_8 = arith.constant 0 : index
    %7 = vector.load %arg1[%c0_7, %c0_8] : memref<8x32xf32, #tpu.memory_space<vmem>>, vector<8x32xf32>
    %c0_9 = arith.constant 0 : index
    %c0_10 = arith.constant 0 : index
    %8 = vector.load %arg2[%c0_9, %c0_10] : memref<8x32xf32, #tpu.memory_space<vmem>>, vector<8x32xf32>
    %9 = vector.extract_strided_slice %5 {offsets = [0, 0], sizes = [8, 128], strides = [1, 1]} : vector<64x128xf32> to vector<8x128xf32>
    %cst_11 = arith.constant dense<0.000000e+00> : vector<8x128xf32>
    %10 = tpu.matmul %7, %6, %cst_11 {dimension_numbers = #tpu.dot_dimension_numbers<[1], [0], [0], [1], [0, 0, 1, 1], [], []>} : vector<8x32xf32>, vector<32x128xf32>, vector<8x128xf32> -> vector<8x128xf32>
    %11 = arith.addf %9, %10 : vector<8x128xf32>
    %12 = arith.negf %11 : vector<8x128xf32>
    %13 = math.exp %12 : vector<8x128xf32>
    %cst_12 = arith.constant 1.000000e+00 : f32
    %14 = vector.broadcast %cst_12 : f32 to vector<8x128xf32>
    %15 = arith.addf %14, %13 : vector<8x128xf32>
    %16 = arith.divf %14, %15 : vector<8x128xf32>
    %17 = math.tanh %11 : vector<8x128xf32>
    %18 = vector.extract_strided_slice %16 {offsets = [0, 0], sizes = [8, 32], strides = [1, 1]} : vector<8x128xf32> to vector<8x32xf32>
    %19 = vector.extract_strided_slice %16 {offsets = [0, 32], sizes = [8, 32], strides = [1, 1]} : vector<8x128xf32> to vector<8x32xf32>
    %20 = vector.extract_strided_slice %17 {offsets = [0, 64], sizes = [8, 32], strides = [1, 1]} : vector<8x128xf32> to vector<8x32xf32>
    %21 = vector.extract_strided_slice %16 {offsets = [0, 96], sizes = [8, 32], strides = [1, 1]} : vector<8x128xf32> to vector<8x32xf32>
    %22 = arith.mulf %19, %8 : vector<8x32xf32>
    %23 = arith.mulf %18, %20 : vector<8x32xf32>
    %24 = arith.addf %22, %23 : vector<8x32xf32>
    %25 = math.tanh %24 : vector<8x32xf32>
    %26 = arith.mulf %21, %25 : vector<8x32xf32>
    %27 = vector.extract_strided_slice %5 {offsets = [8, 0], sizes = [8, 128], strides = [1, 1]} : vector<64x128xf32> to vector<8x128xf32>
    %cst_13 = arith.constant dense<0.000000e+00> : vector<8x128xf32>
    %28 = tpu.matmul %26, %6, %cst_13 {dimension_numbers = #tpu.dot_dimension_numbers<[1], [0], [0], [1], [0, 0, 1, 1], [], []>} : vector<8x32xf32>, vector<32x128xf32>, vector<8x128xf32> -> vector<8x128xf32>
    %29 = arith.addf %27, %28 : vector<8x128xf32>
    %30 = arith.negf %29 : vector<8x128xf32>
    %31 = math.exp %30 : vector<8x128xf32>
    %cst_14 = arith.constant 1.000000e+00 : f32
    %32 = vector.broadcast %cst_14 : f32 to vector<8x128xf32>
    %33 = arith.addf %32, %31 : vector<8x128xf32>
    %34 = arith.divf %32, %33 : vector<8x128xf32>
    %35 = math.tanh %29 : vector<8x128xf32>
    %36 = vector.extract_strided_slice %34 {offsets = [0, 0], sizes = [8, 32], strides = [1, 1]} : vector<8x128xf32> to vector<8x32xf32>
    %37 = vector.extract_strided_slice %34 {offsets = [0, 32], sizes = [8, 32], strides = [1, 1]} : vector<8x128xf32> to vector<8x32xf32>
    %38 = vector.extract_strided_slice %35 {offsets = [0, 64], sizes = [8, 32], strides = [1, 1]} : vector<8x128xf32> to vector<8x32xf32>
    %39 = vector.extract_strided_slice %34 {offsets = [0, 96], sizes = [8, 32], strides = [1, 1]} : vector<8x128xf32> to vector<8x32xf32>
    %40 = arith.mulf %37, %24 : vector<8x32xf32>
    %41 = arith.mulf %36, %38 : vector<8x32xf32>
    %42 = arith.addf %40, %41 : vector<8x32xf32>
    %43 = math.tanh %42 : vector<8x32xf32>
    %44 = arith.mulf %39, %43 : vector<8x32xf32>
    %45 = vector.extract_strided_slice %5 {offsets = [16, 0], sizes = [8, 128], strides = [1, 1]} : vector<64x128xf32> to vector<8x128xf32>
    %cst_15 = arith.constant dense<0.000000e+00> : vector<8x128xf32>
    %46 = tpu.matmul %44, %6, %cst_15 {dimension_numbers = #tpu.dot_dimension_numbers<[1], [0], [0], [1], [0, 0, 1, 1], [], []>} : vector<8x32xf32>, vector<32x128xf32>, vector<8x128xf32> -> vector<8x128xf32>
    %47 = arith.addf %45, %46 : vector<8x128xf32>
    %48 = arith.negf %47 : vector<8x128xf32>
    %49 = math.exp %48 : vector<8x128xf32>
    %cst_16 = arith.constant 1.000000e+00 : f32
    %50 = vector.broadcast %cst_16 : f32 to vector<8x128xf32>
    %51 = arith.addf %50, %49 : vector<8x128xf32>
    %52 = arith.divf %50, %51 : vector<8x128xf32>
    %53 = math.tanh %47 : vector<8x128xf32>
    %54 = vector.extract_strided_slice %52 {offsets = [0, 0], sizes = [8, 32], strides = [1, 1]} : vector<8x128xf32> to vector<8x32xf32>
    %55 = vector.extract_strided_slice %52 {offsets = [0, 32], sizes = [8, 32], strides = [1, 1]} : vector<8x128xf32> to vector<8x32xf32>
    %56 = vector.extract_strided_slice %53 {offsets = [0, 64], sizes = [8, 32], strides = [1, 1]} : vector<8x128xf32> to vector<8x32xf32>
    %57 = vector.extract_strided_slice %52 {offsets = [0, 96], sizes = [8, 32], strides = [1, 1]} : vector<8x128xf32> to vector<8x32xf32>
    %58 = arith.mulf %55, %42 : vector<8x32xf32>
    %59 = arith.mulf %54, %56 : vector<8x32xf32>
    %60 = arith.addf %58, %59 : vector<8x32xf32>
    %61 = math.tanh %60 : vector<8x32xf32>
    %62 = arith.mulf %57, %61 : vector<8x32xf32>
    %63 = vector.extract_strided_slice %5 {offsets = [24, 0], sizes = [8, 128], strides = [1, 1]} : vector<64x128xf32> to vector<8x128xf32>
    %cst_17 = arith.constant dense<0.000000e+00> : vector<8x128xf32>
    %64 = tpu.matmul %62, %6, %cst_17 {dimension_numbers = #tpu.dot_dimension_numbers<[1], [0], [0], [1], [0, 0, 1, 1], [], []>} : vector<8x32xf32>, vector<32x128xf32>, vector<8x128xf32> -> vector<8x128xf32>
    %65 = arith.addf %63, %64 : vector<8x128xf32>
    %66 = arith.negf %65 : vector<8x128xf32>
    %67 = math.exp %66 : vector<8x128xf32>
    %cst_18 = arith.constant 1.000000e+00 : f32
    %68 = vector.broadcast %cst_18 : f32 to vector<8x128xf32>
    %69 = arith.addf %68, %67 : vector<8x128xf32>
    %70 = arith.divf %68, %69 : vector<8x128xf32>
    %71 = math.tanh %65 : vector<8x128xf32>
    %72 = vector.extract_strided_slice %70 {offsets = [0, 0], sizes = [8, 32], strides = [1, 1]} : vector<8x128xf32> to vector<8x32xf32>
    %73 = vector.extract_strided_slice %70 {offsets = [0, 32], sizes = [8, 32], strides = [1, 1]} : vector<8x128xf32> to vector<8x32xf32>
    %74 = vector.extract_strided_slice %71 {offsets = [0, 64], sizes = [8, 32], strides = [1, 1]} : vector<8x128xf32> to vector<8x32xf32>
    %75 = vector.extract_strided_slice %70 {offsets = [0, 96], sizes = [8, 32], strides = [1, 1]} : vector<8x128xf32> to vector<8x32xf32>
    %76 = arith.mulf %73, %60 : vector<8x32xf32>
    %77 = arith.mulf %72, %74 : vector<8x32xf32>
    %78 = arith.addf %76, %77 : vector<8x32xf32>
    %79 = math.tanh %78 : vector<8x32xf32>
    %80 = arith.mulf %75, %79 : vector<8x32xf32>
    %81 = vector.extract_strided_slice %5 {offsets = [32, 0], sizes = [8, 128], strides = [1, 1]} : vector<64x128xf32> to vector<8x128xf32>
    %cst_19 = arith.constant dense<0.000000e+00> : vector<8x128xf32>
    %82 = tpu.matmul %80, %6, %cst_19 {dimension_numbers = #tpu.dot_dimension_numbers<[1], [0], [0], [1], [0, 0, 1, 1], [], []>} : vector<8x32xf32>, vector<32x128xf32>, vector<8x128xf32> -> vector<8x128xf32>
    %83 = arith.addf %81, %82 : vector<8x128xf32>
    %84 = arith.negf %83 : vector<8x128xf32>
    %85 = math.exp %84 : vector<8x128xf32>
    %cst_20 = arith.constant 1.000000e+00 : f32
    %86 = vector.broadcast %cst_20 : f32 to vector<8x128xf32>
    %87 = arith.addf %86, %85 : vector<8x128xf32>
    %88 = arith.divf %86, %87 : vector<8x128xf32>
    %89 = math.tanh %83 : vector<8x128xf32>
    %90 = vector.extract_strided_slice %88 {offsets = [0, 0], sizes = [8, 32], strides = [1, 1]} : vector<8x128xf32> to vector<8x32xf32>
    %91 = vector.extract_strided_slice %88 {offsets = [0, 32], sizes = [8, 32], strides = [1, 1]} : vector<8x128xf32> to vector<8x32xf32>
    %92 = vector.extract_strided_slice %89 {offsets = [0, 64], sizes = [8, 32], strides = [1, 1]} : vector<8x128xf32> to vector<8x32xf32>
    %93 = vector.extract_strided_slice %88 {offsets = [0, 96], sizes = [8, 32], strides = [1, 1]} : vector<8x128xf32> to vector<8x32xf32>
    %94 = arith.mulf %91, %78 : vector<8x32xf32>
    %95 = arith.mulf %90, %92 : vector<8x32xf32>
    %96 = arith.addf %94, %95 : vector<8x32xf32>
    %97 = math.tanh %96 : vector<8x32xf32>
    %98 = arith.mulf %93, %97 : vector<8x32xf32>
    %99 = vector.extract_strided_slice %5 {offsets = [40, 0], sizes = [8, 128], strides = [1, 1]} : vector<64x128xf32> to vector<8x128xf32>
    %cst_21 = arith.constant dense<0.000000e+00> : vector<8x128xf32>
    %100 = tpu.matmul %98, %6, %cst_21 {dimension_numbers = #tpu.dot_dimension_numbers<[1], [0], [0], [1], [0, 0, 1, 1], [], []>} : vector<8x32xf32>, vector<32x128xf32>, vector<8x128xf32> -> vector<8x128xf32>
    %101 = arith.addf %99, %100 : vector<8x128xf32>
    %102 = arith.negf %101 : vector<8x128xf32>
    %103 = math.exp %102 : vector<8x128xf32>
    %cst_22 = arith.constant 1.000000e+00 : f32
    %104 = vector.broadcast %cst_22 : f32 to vector<8x128xf32>
    %105 = arith.addf %104, %103 : vector<8x128xf32>
    %106 = arith.divf %104, %105 : vector<8x128xf32>
    %107 = math.tanh %101 : vector<8x128xf32>
    %108 = vector.extract_strided_slice %106 {offsets = [0, 0], sizes = [8, 32], strides = [1, 1]} : vector<8x128xf32> to vector<8x32xf32>
    %109 = vector.extract_strided_slice %106 {offsets = [0, 32], sizes = [8, 32], strides = [1, 1]} : vector<8x128xf32> to vector<8x32xf32>
    %110 = vector.extract_strided_slice %107 {offsets = [0, 64], sizes = [8, 32], strides = [1, 1]} : vector<8x128xf32> to vector<8x32xf32>
    %111 = vector.extract_strided_slice %106 {offsets = [0, 96], sizes = [8, 32], strides = [1, 1]} : vector<8x128xf32> to vector<8x32xf32>
    %112 = arith.mulf %109, %96 : vector<8x32xf32>
    %113 = arith.mulf %108, %110 : vector<8x32xf32>
    %114 = arith.addf %112, %113 : vector<8x32xf32>
    %115 = math.tanh %114 : vector<8x32xf32>
    %116 = arith.mulf %111, %115 : vector<8x32xf32>
    %117 = vector.extract_strided_slice %5 {offsets = [48, 0], sizes = [8, 128], strides = [1, 1]} : vector<64x128xf32> to vector<8x128xf32>
    %cst_23 = arith.constant dense<0.000000e+00> : vector<8x128xf32>
    %118 = tpu.matmul %116, %6, %cst_23 {dimension_numbers = #tpu.dot_dimension_numbers<[1], [0], [0], [1], [0, 0, 1, 1], [], []>} : vector<8x32xf32>, vector<32x128xf32>, vector<8x128xf32> -> vector<8x128xf32>
    %119 = arith.addf %117, %118 : vector<8x128xf32>
    %120 = arith.negf %119 : vector<8x128xf32>
    %121 = math.exp %120 : vector<8x128xf32>
    %cst_24 = arith.constant 1.000000e+00 : f32
    %122 = vector.broadcast %cst_24 : f32 to vector<8x128xf32>
    %123 = arith.addf %122, %121 : vector<8x128xf32>
    %124 = arith.divf %122, %123 : vector<8x128xf32>
    %125 = math.tanh %119 : vector<8x128xf32>
    %126 = vector.extract_strided_slice %124 {offsets = [0, 0], sizes = [8, 32], strides = [1, 1]} : vector<8x128xf32> to vector<8x32xf32>
    %127 = vector.extract_strided_slice %124 {offsets = [0, 32], sizes = [8, 32], strides = [1, 1]} : vector<8x128xf32> to vector<8x32xf32>
    %128 = vector.extract_strided_slice %125 {offsets = [0, 64], sizes = [8, 32], strides = [1, 1]} : vector<8x128xf32> to vector<8x32xf32>
    %129 = vector.extract_strided_slice %124 {offsets = [0, 96], sizes = [8, 32], strides = [1, 1]} : vector<8x128xf32> to vector<8x32xf32>
    %130 = arith.mulf %127, %114 : vector<8x32xf32>
    %131 = arith.mulf %126, %128 : vector<8x32xf32>
    %132 = arith.addf %130, %131 : vector<8x32xf32>
    %133 = math.tanh %132 : vector<8x32xf32>
    %134 = arith.mulf %129, %133 : vector<8x32xf32>
    %135 = vector.extract_strided_slice %5 {offsets = [56, 0], sizes = [8, 128], strides = [1, 1]} : vector<64x128xf32> to vector<8x128xf32>
    %cst_25 = arith.constant dense<0.000000e+00> : vector<8x128xf32>
    %136 = tpu.matmul %134, %6, %cst_25 {dimension_numbers = #tpu.dot_dimension_numbers<[1], [0], [0], [1], [0, 0, 1, 1], [], []>} : vector<8x32xf32>, vector<32x128xf32>, vector<8x128xf32> -> vector<8x128xf32>
    %137 = arith.addf %135, %136 : vector<8x128xf32>
    %138 = arith.negf %137 : vector<8x128xf32>
    %139 = math.exp %138 : vector<8x128xf32>
    %cst_26 = arith.constant 1.000000e+00 : f32
    %140 = vector.broadcast %cst_26 : f32 to vector<8x128xf32>
    %141 = arith.addf %140, %139 : vector<8x128xf32>
    %142 = arith.divf %140, %141 : vector<8x128xf32>
    %143 = math.tanh %137 : vector<8x128xf32>
    %144 = vector.extract_strided_slice %142 {offsets = [0, 0], sizes = [8, 32], strides = [1, 1]} : vector<8x128xf32> to vector<8x32xf32>
    %145 = vector.extract_strided_slice %142 {offsets = [0, 32], sizes = [8, 32], strides = [1, 1]} : vector<8x128xf32> to vector<8x32xf32>
    %146 = vector.extract_strided_slice %143 {offsets = [0, 64], sizes = [8, 32], strides = [1, 1]} : vector<8x128xf32> to vector<8x32xf32>
    %147 = vector.extract_strided_slice %142 {offsets = [0, 96], sizes = [8, 32], strides = [1, 1]} : vector<8x128xf32> to vector<8x32xf32>
    %148 = arith.mulf %145, %132 : vector<8x32xf32>
    %149 = arith.mulf %144, %146 : vector<8x32xf32>
    %150 = arith.addf %148, %149 : vector<8x32xf32>
    %151 = math.tanh %150 : vector<8x32xf32>
    %152 = arith.mulf %147, %151 : vector<8x32xf32>
    %c0_27 = arith.constant 0 : index
    %c0_28 = arith.constant 0 : index
    %153 = vector.load %arg6[%c0_27, %c0_28] : memref<32x16xf32, #tpu.memory_space<vmem>>, vector<32x16xf32>
    %cst_29 = arith.constant dense<0.000000e+00> : vector<8x16xf32>
    %154 = tpu.matmul %152, %153, %cst_29 {dimension_numbers = #tpu.dot_dimension_numbers<[1], [0], [0], [1], [0, 0, 1, 1], [], []>} : vector<8x32xf32>, vector<32x16xf32>, vector<8x16xf32> -> vector<8x16xf32>
    %c0_30 = arith.constant 0 : index
    %c0_31 = arith.constant 0 : index
    %155 = vector.load %arg7[%c0_30, %c0_31] : memref<1x16xf32, #tpu.memory_space<vmem>>, vector<1x16xf32>
    %156 = vector.broadcast %155 : vector<1x16xf32> to vector<8x16xf32>
    %157 = arith.addf %154, %156 : vector<8x16xf32>
    %c0_32 = arith.constant 0 : index
    %c0_33 = arith.constant 0 : index
    %158 = vector.load %arg8[%c0_32, %c0_33] : memref<8x16xf32, #tpu.memory_space<vmem>>, vector<8x16xf32>
    tpu.vector_store %arg8[%c0_32, %c0_33], %157 {strides = array<i32>} : memref<8x16xf32, #tpu.memory_space<vmem>>, vector<8x16xf32>,
    %c0_34 = arith.constant 0 : index
    %c0_35 = arith.constant 0 : index
    %159 = vector.load %arg9[%c0_34, %c0_35] : memref<8x32xf32, #tpu.memory_space<vmem>>, vector<8x32xf32>
    tpu.vector_store %arg9[%c0_34, %c0_35], %152 {strides = array<i32>} : memref<8x32xf32, #tpu.memory_space<vmem>>, vector<8x32xf32>,
    %c0_36 = arith.constant 0 : index
    %c0_37 = arith.constant 0 : index
    %160 = vector.load %arg10[%c0_36, %c0_37] : memref<8x32xf32, #tpu.memory_space<vmem>>, vector<8x32xf32>
    tpu.vector_store %arg10[%c0_36, %c0_37], %150 {strides = array<i32>} : memref<8x32xf32, #tpu.memory_space<vmem>>, vector<8x32xf32>,
    return
  }
}

</mosaic_0001>

<bundles_post_ra>
// kernel: tpu_custom_call.1
= control target key start
LH: loop header
LB: loop body
LE: loop exit
PB: predicated region body
PF: predicated region fallthrough
CT: control target
= control target key end

     0   :  { %16 = vsyncpa [#allocation3], 0  ;;  %vm51_vm0 = vcmask 130048   ;;  %v1523_v3 = vmov 0.0|0.0   ;;  %vm1524_vm1 = vmmov 0   ;;  %v1525_v10 = vmov 0.0   ;;  %s1820_s0 = inlined_call_operand.vmem [shape: f32[64,16], index: 0, kind: input, shape index: {}]   ;;  %s1821_s1 = inlined_call_operand.vmem [shape: f32[8,32], index: 1, kind: input, shape index: {}]   ;;  %s1822_s2 = inlined_call_operand.vmem [shape: f32[8,32], index: 2, kind: input, shape index: {}]   ;;  %s1823_s3 = inlined_call_operand.vmem [shape: f32[16,128], index: 3, kind: input, shape index: {}]   ;;  %s1824_s4 = inlined_call_operand.vmem [shape: f32[32,128], index: 4, kind: input, shape index: {}]   ;;  %s1825_s5 = inlined_call_operand.vmem [shape: f32[1,128], index: 5, kind: input, shape index: {}]   ;;  %s1826_s6 = inlined_call_operand.vmem [shape: f32[32,16], index: 6, kind: input, shape index: {}]   ;;  %s1827_s7 = inlined_call_operand.vmem [shape: f32[1,16], index: 7, kind: input, shape index: {}]   ;;  %s1828_s8 = inlined_call_operand.hbm [shape: f32[8,16], index: 8, kind: output, shape index: {0}]   ;;  %s1829_s9 = inlined_call_operand.hbm [shape: f32[8,32], index: 9, kind: output, shape index: {1}]   ;;  %s1830_s10 = inlined_call_operand.hbm [shape: f32[8,32], index: 10, kind: output, shape index: {2}]  }
   0x1   :  { %v42_v0 = vld [vmem:[%s1823_s3] sm:$0xff]  ;;  %v43_v1 = vld [vmem:[%s1823_s3 + $0x8] sm:$0xff]  ;;  %1326 = vmatprep.subr.bf16.mxu1 %v1523_v3  ;;  %v183_v8 = vld [vmem:[%s1824_s4 + $0x10] sm:$0xff]  ;;  %1231 = vmatprep.mubr.msk.f32.mxu1 %vm1524_vm1, %v1525_v10 }
   0x2   :  { %v181_v2 = vld [vmem:[%s1824_s4] sm:$0xff]  ;;  %v1322_v4 = vpack.c.bf16 %v43_v1, %v42_v0  ;;  %v182_v5 = vld [vmem:[%s1824_s4 + $0x8] sm:$0xff]  ;;  %v184_v9 = vld [vmem:[%s1824_s4 + $0x18] sm:$0xff] }
   0x3   :  { %v34_v6 = vld [vmem:[%s1820_s0] sm:$0xff]  ;;  %v1603_v7 = vpack.c.bf16 %v182_v5, %v181_v2 }
   0x4   :  { %1211 = vmatprep.mubr.msk.f32.mxu0 %vm51_vm0, %v34_v6  ;;  %1323 = vmatprep.subr.bf16.mxu0 %v1322_v4 }
   0x5   :  { %17 = vsyncpa [#allocation5], 0  ;;  %1328 = vmatpush3.bf16.msra.mxu1 %v1603_v7  ;;  %1325 = vmatpush3.bf16.msra.mxu0 %v1322_v4  ;;  %v35_v11 = vld [vmem:[%s1820_s0 + $0x8] sm:$0xff]  ;;  %v1618_v12 = vpack.c.bf16 %v184_v9, %v183_v8  ;;  %v185_v13 = vld [vmem:[%s1821_s1] sm:$0xff]  ;;  %vm187_vm2 = vcmask 261120   ;;  %s1526_s30 = smov 64  }
   0x6   :  { %1329 = vmatprep.subr.bf16.mxu1 %v1523_v3  ;;  %1338 = vmatprep.subr.bf16.mxu0 %v1523_v3  ;;  %v1642_v14 = vld [vmem:[%s1825_s5] ss:$0 sm:$0xff]  ;;  %s1527_s13 = smov 32   ;;  %v36_v51 = vld [vmem:[%s1820_s0 + $0x10] sm:$0xff]  ;;  %v37_v52 = vld [vmem:[%s1820_s0 + $0x18] sm:$0xff]  ;;  %s1528_s1 = smov 96  }
   0x7   :  { %v186_v22 = vld [vmem:[%s1822_s2] sm:$0xff]  ;;  %v39_v54 = vld [vmem:[%s1820_s0 + $0x28] sm:$0xff]  ;;  %v40_v55 = vld [vmem:[%s1820_s0 + $0x30] sm:$0xff] }
   0x8   :  { %1212 = vmatmul.mubr.msk.f32.vlgmr.msra.gmra.mrb[0].mxu0 %vm51_vm0, %v35_v11  ;;  %v38_v53 = vld [vmem:[%s1820_s0 + $0x20] sm:$0xff]  ;;  %v41_v56 = vld [vmem:[%s1820_s0 + $0x38] sm:$0xff] }
   0x9   :  { %1331 = vmatpush3.bf16.msra.mxu1 %v1618_v12  ;;  %1340 = vmatpush3.bf16.msra.mxu0 %v1603_v7 }
   0xa   :  { %1332 = vmatprep.subr.bf16.mxu1 %v1523_v3  ;;  %1341 = vmatprep.subr.bf16.mxu0 %v1523_v3 }
   0xb   :  { %1214 = vmatprep.mubr.msk.f32.mxu0 %vm51_vm0, %v36_v51 }
   0xc   :  { %1232 = vmatmul.mubr.msk.f32.vlgmr.msra.gmra.mrb[0].mxu1 %vm187_vm2, %v185_v13  ;;  %1215 = vmatmul.mubr.msk.f32.gmra.mrb[2].mxu0 %vm51_vm0, %v37_v52 }
   0xd   :  { %1334 = vmatpush3.bf16.msra.mxu1 %v1603_v7  ;;  %1242 = vmatprep.mubr.msk.f32.mxu1 %vm1524_vm1, %v1525_v10 }
   0xe   :  { %1335 = vmatprep.subr.bf16.mxu1 %v1523_v3  ;;  %1343 = vmatpush3.bf16.msra.mxu0 %v1618_v12 }
   0xf   :  { %1350 = vmatprep.subr.bf16.mxu0 %v1523_v3  ;;  %1217 = vmatprep.mubr.msk.f32.mxu0 %vm51_vm0, %v38_v53 }
  0x10   :  { %1218 = vmatmul.mubr.msk.f32.gmra.mrb[4].mxu0 %vm51_vm0, %v39_v54 }
  0x11   :  { %1337 = vmatpush3.bf16.msra.mxu1 %v1618_v12  ;;  %1220 = vmatprep.mubr.msk.f32.mxu0 %vm51_vm0, %v40_v55 }
  0x12   :  { %1344 = vmatprep.subr.bf16.mxu1 %v1523_v3 }
  0x14   :  { %1221 = vmatmul.mubr.msk.f32.gmra.mrb[6].mxu0 %vm51_vm0, %v41_v56 }
  0x15   :  { %1253 = vmatprep.mubr.msk.f32.mxu0 %vm1524_vm1, %v1525_v10 }
  0xdb   :  { %v1213_v15 = vpop.f32.mrb[0].mxu0 }
  0xdc   :  { %v142_v16 = vpop.f32.mrb[1].mxu0  ;;  %v148_v37 = vadd.f32 %v1213_v15, %v1642_v14 }
  0xdd   :  { %v143_v17 = vadd.f32 %v1642_v14, %v142_v16 }
  0xdf   :  { %v257_v18 = vpop.f32.mrb[0].mxu1  ;;  %v1216_v60 = vpop.f32.mrb[2].mxu0 }
  0xe0   :  { %v261_v19 = vadd.f32 %v257_v18, %v143_v17  ;;  %v1233_v20 = vpop.f32.mrb[1].mxu1  ;;  %v152_v61 = vpop.f32.mrb[3].mxu0 }
  0xe1   :  { %v153_v4 = vadd.f32 %v1642_v14, %v152_v61 }
  0xe2   :  { %1389 = vtanh.f32 %v261_v19  ;;  %v1135_v23 = vmul.f32 -1.442695, %v261_v19 }
  0xe3   :  { %v1691_v62 = vpop.f32.mrb[4].mxu0 }
  0xe4   :  { %1391 = vpow2.f32 %v1135_v23  ;;  %v1693_v63 = vpop.f32.mrb[5].mxu0 }
  0xe7   :  { %v1695_v0 = vpop.f32.mrb[6].mxu0 }
  0xe8   :  { %v1697_v1 = vpop.f32.mrb[7].mxu0 }
  0xec   :  { %v1390_v21 = vpop.eup %1389 }
  0xed   :  { %275 = vrot.lane.b32.xlu0 %v1390_v21, %s1526_s30 }
  0xee   :  { %v1392_v24 = vpop.eup %1391 }
  0xef   :  { %v265_v25 = vadd.f32 1.0, %v1392_v24 }
  0xf1   :  { %270 = vrot.lane.b32.xlu0 %v186_v22, %s1527_s13  ;;  %1393 = vrcp.f32 %v265_v25 }
  0xfb   :  { %v1394_v26 = vpop.eup %1393 }
 0x15f   :  { %v276_v27 = vpop.permute.xlu0 %275 }
 0x160   :  { %v278_v28 = vmul.f32 %v1394_v26, %v276_v27 }
 0x162   :  { %280 = vrot.lane.b32.xlu1 %v278_v28, %s1527_s13 }
 0x163   :  { %v271_v29 = vpop.permute.xlu0 %270 }
 0x164   :  { %v273_v30 = vmul.f32 %v1394_v26, %v271_v29 }
 0x1d4   :  { %v281_v31 = vpop.permute.xlu1 %280 }
 0x1d5   :  { %v283_v32 = vadd.f32 %v281_v31, %v273_v30 }
 0x1d7   :  { %1395 = vtanh.f32 %v283_v32 }
 0x1e1   :  { %v1396_v33 = vpop.eup %1395 }
 0x1e2   :  { %286 = vrot.lane.b32.xlu1 %v1396_v33, %s1526_s30 }
 0x254   :  { %v287_v34 = vpop.permute.xlu1 %286 }
 0x255   :  { %v289_v35 = vmul.f32 %v1394_v26, %v287_v34  ;;  %v158_v26 = vadd.f32 %v1216_v60, %v1642_v14 }
 0x257   :  { %291 = vrot.lane.b32.xlu0 %v289_v35, %s1527_s13 }
 0x2c9   :  { %v292_v36 = vpop.permute.xlu0 %291 }
 0x2ca   :  { %1243 = vmatmul.mubr.msk.f32.vlgmr.msra.gmra.mrb[2].mxu1 %vm187_vm2, %v292_v36 }
 0x2cb   :  { %1346 = vmatpush3.bf16.msra.mxu1 %v1603_v7  ;;  %1264 = vmatprep.mubr.msk.f32.mxu1 %vm1524_vm1, %v1525_v10 }
 0x2cc   :  { %1347 = vmatprep.subr.bf16.mxu1 %v1523_v3 }
 0x2cf   :  { %1349 = vmatpush3.bf16.msra.mxu1 %v1618_v12 }
 0x2d0   :  { %1356 = vmatprep.subr.bf16.mxu1 %v1523_v3 }
 0x39d   :  { %v361_v38 = vpop.f32.mrb[2].mxu1 }
 0x39e   :  { %v365_v39 = vadd.f32 %v361_v38, %v148_v37  ;;  %v1244_v40 = vpop.f32.mrb[3].mxu1 }
 0x3a0   :  { %1397 = vtanh.f32 %v365_v39  ;;  %v1137_v42 = vmul.f32 -1.442695, %v365_v39 }
 0x3a2   :  { %1399 = vpow2.f32 %v1137_v42 }
 0x3aa   :  { %v1398_v41 = vpop.eup %1397 }
 0x3ab   :  { %375 = vrot.lane.b32.xlu1 %v1398_v41, %s1526_s30 }
 0x3ac   :  { %v1400_v43 = vpop.eup %1399 }
 0x3ad   :  { %v369_v44 = vadd.f32 1.0, %v1400_v43 }
 0x3af   :  { %1401 = vrcp.f32 %v369_v44  ;;  %v163_v44 = vadd.f32 %v1642_v14, %v1693_v63  ;;  %v168_v63 = vadd.f32 %v1691_v62, %v1642_v14 }
 0x3b9   :  { %v1402_v45 = vpop.eup %1401 }
 0x3ba   :  { %v373_v48 = vmul.f32 %v1402_v45, %v283_v32 }
 0x41d   :  { %v376_v46 = vpop.permute.xlu1 %375 }
 0x41e   :  { %v378_v47 = vmul.f32 %v1402_v45, %v376_v46 }
 0x420   :  { %380 = vrot.lane.b32.xlu0 %v378_v47, %s1527_s13 }
 0x492   :  { %v381_v49 = vpop.permute.xlu0 %380 }
 0x493   :  { %v383_v50 = vadd.f32 %v381_v49, %v373_v48 }
 0x495   :  { %1403 = vtanh.f32 %v383_v50 }
 0x49f   :  { %v1404_v57 = vpop.eup %1403 }
 0x4a0   :  { %386 = vrot.lane.b32.xlu1 %v1404_v57, %s1526_s30 }
 0x512   :  { %v387_v58 = vpop.permute.xlu1 %386 }
 0x513   :  { %v389_v59 = vmul.f32 %v1402_v45, %v387_v58 }
 0x515   :  { %391 = vrot.lane.b32.xlu0 %v389_v59, %s1527_s13 }
 0x587   :  { %v392_v2 = vpop.permute.xlu0 %391 }
 0x588   :  { %1254 = vmatmul.mubr.msk.f32.vlgmr.msra.gmra.mrb[8].mxu0 %vm187_vm2, %v392_v2 }
 0x589   :  { %1352 = vmatpush3.bf16.msra.mxu0 %v1603_v7  ;;  %1275 = vmatprep.mubr.msk.f32.mxu0 %vm1524_vm1, %v1525_v10 }
 0x58a   :  { %1353 = vmatprep.subr.bf16.mxu0 %v1523_v3 }
 0x58d   :  { %1355 = vmatpush3.bf16.msra.mxu0 %v1618_v12 }
 0x58e   :  { %1362 = vmatprep.subr.bf16.mxu0 %v1523_v3 }
 0x65b   :  { %v461_v5 = vpop.f32.mrb[8].mxu0 }
 0x65c   :  { %v465_v6 = vadd.f32 %v461_v5, %v153_v4  ;;  %v1255_v8 = vpop.f32.mrb[9].mxu0 }
 0x65e   :  { %1405 = vtanh.f32 %v465_v6  ;;  %v1139_v11 = vmul.f32 -1.442695, %v465_v6 }
 0x660   :  { %1407 = vpow2.f32 %v1139_v11 }
 0x668   :  { %v1406_v9 = vpop.eup %1405 }
 0x669   :  { %475 = vrot.lane.b32.xlu1 %v1406_v9, %s1526_s30 }
 0x66a   :  { %v1408_v13 = vpop.eup %1407 }
 0x66b   :  { %v469_v15 = vadd.f32 1.0, %v1408_v13 }
 0x66d   :  { %1409 = vrcp.f32 %v469_v15 }
 0x677   :  { %v1410_v16 = vpop.eup %1409 }
 0x678   :  { %v473_v19 = vmul.f32 %v1410_v16, %v383_v50 }
 0x6db   :  { %v476_v17 = vpop.permute.xlu1 %475 }
 0x6dc   :  { %v478_v18 = vmul.f32 %v1410_v16, %v476_v17 }
 0x6de   :  { %480 = vrot.lane.b32.xlu0 %v478_v18, %s1527_s13 }
 0x750   :  { %v481_v20 = vpop.permute.xlu0 %480 }
 0x751   :  { %v483_v21 = vadd.f32 %v481_v20, %v473_v19 }
 0x753   :  { %1411 = vtanh.f32 %v483_v21 }
 0x75d   :  { %v1412_v22 = vpop.eup %1411 }
 0x75e   :  { %486 = vrot.lane.b32.xlu1 %v1412_v22, %s1526_s30 }
 0x7d0   :  { %v487_v23 = vpop.permute.xlu1 %486 }
 0x7d1   :  { %v489_v24 = vmul.f32 %v1410_v16, %v487_v23 }
 0x7d3   :  { %491 = vrot.lane.b32.xlu0 %v489_v24, %s1527_s13 }
 0x845   :  { %v492_v25 = vpop.permute.xlu0 %491 }
 0x846   :  { %1265 = vmatmul.mubr.msk.f32.vlgmr.msra.gmra.mrb[4].mxu1 %vm187_vm2, %v492_v25 }
 0x847   :  { %1358 = vmatpush3.bf16.msra.mxu1 %v1603_v7  ;;  %1286 = vmatprep.mubr.msk.f32.mxu1 %vm1524_vm1, %v1525_v10 }
 0x848   :  { %1359 = vmatprep.subr.bf16.mxu1 %v1523_v3 }
 0x84b   :  { %1361 = vmatpush3.bf16.msra.mxu1 %v1618_v12 }
 0x84c   :  { %1368 = vmatprep.subr.bf16.mxu1 %v1523_v3 }
 0x919   :  { %v561_v27 = vpop.f32.mrb[4].mxu1 }
 0x91a   :  { %v565_v28 = vadd.f32 %v561_v27, %v158_v26  ;;  %v1266_v29 = vpop.f32.mrb[5].mxu1 }
 0x91c   :  { %1413 = vtanh.f32 %v565_v28  ;;  %v1141_v31 = vmul.f32 -1.442695, %v565_v28 }
 0x91e   :  { %1415 = vpow2.f32 %v1141_v31 }
 0x926   :  { %v1414_v30 = vpop.eup %1413 }
 0x927   :  { %575 = vrot.lane.b32.xlu1 %v1414_v30, %s1526_s30 }
 0x928   :  { %v1416_v32 = vpop.eup %1415 }
 0x929   :  { %v569_v33 = vadd.f32 1.0, %v1416_v32 }
 0x92b   :  { %1417 = vrcp.f32 %v569_v33 }
 0x935   :  { %v1418_v34 = vpop.eup %1417 }
 0x936   :  { %v573_v37 = vmul.f32 %v1418_v34, %v483_v21  ;;  %v173_v21 = vadd.f32 %v1642_v14, %v1697_v1 }
 0x999   :  { %v576_v35 = vpop.permute.xlu1 %575 }
 0x99a   :  { %v578_v36 = vmul.f32 %v1418_v34, %v576_v35 }
 0x99c   :  { %580 = vrot.lane.b32.xlu0 %v578_v36, %s1527_s13 }
 0xa0e   :  { %v581_v38 = vpop.permute.xlu0 %580 }
 0xa0f   :  { %v583_v39 = vadd.f32 %v581_v38, %v573_v37  ;;  %v178_v37 = vadd.f32 %v1695_v0, %v1642_v14  ;;  %v990_v0 = vld [vmem:[%s1826_s6] sm:$0xff] }
 0xa11   :  { %1419 = vtanh.f32 %v583_v39 }
 0xa1b   :  { %v1420_v40 = vpop.eup %1419 }
 0xa1c   :  { %586 = vrot.lane.b32.xlu1 %v1420_v40, %s1526_s30 }
 0xa8e   :  { %v587_v41 = vpop.permute.xlu1 %586 }
 0xa8f   :  { %v589_v42 = vmul.f32 %v1418_v34, %v587_v41 }
 0xa91   :  { %591 = vrot.lane.b32.xlu0 %v589_v42, %s1527_s13 }
 0xb03   :  { %v592_v43 = vpop.permute.xlu0 %591 }
 0xb04   :  { %1276 = vmatmul.mubr.msk.f32.vlgmr.msra.gmra.mrb[10].mxu0 %vm187_vm2, %v592_v43 }
 0xb05   :  { %1364 = vmatpush3.bf16.msra.mxu0 %v1603_v7  ;;  %1297 = vmatprep.mubr.msk.f32.mxu0 %vm1524_vm1, %v1525_v10 }
 0xb06   :  { %1365 = vmatprep.subr.bf16.mxu0 %v1523_v3 }
 0xb09   :  { %1367 = vmatpush3.bf16.msra.mxu0 %v1618_v12 }
 0xb0a   :  { %1374 = vmatprep.subr.bf16.mxu0 %v1523_v3 }
 0xbd7   :  { %v661_v45 = vpop.f32.mrb[10].mxu0 }
 0xbd8   :  { %v665_v46 = vadd.f32 %v661_v45, %v163_v44  ;;  %v1277_v47 = vpop.f32.mrb[11].mxu0 }
 0xbda   :  { %1421 = vtanh.f32 %v665_v46  ;;  %v1143_v49 = vmul.f32 -1.442695, %v665_v46 }
 0xbdc   :  { %1423 = vpow2.f32 %v1143_v49 }
 0xbe4   :  { %v1422_v48 = vpop.eup %1421 }
 0xbe5   :  { %675 = vrot.lane.b32.xlu1 %v1422_v48, %s1526_s30 }
 0xbe6   :  { %v1424_v50 = vpop.eup %1423 }
 0xbe7   :  { %v669_v51 = vadd.f32 1.0, %v1424_v50  ;;  %v991_v50 = vld [vmem:[%s1826_s6 + $0x8] sm:$0xff] }
 0xbe9   :  { %1425 = vrcp.f32 %v669_v51  ;;  %v992_v51 = vld [vmem:[%s1826_s6 + $0x10] sm:$0xff] }
 0xbf3   :  { %v1426_v52 = vpop.eup %1425 }
 0xbf4   :  { %v673_v55 = vmul.f32 %v1426_v52, %v583_v39 }
 0xc57   :  { %v676_v53 = vpop.permute.xlu1 %675 }
 0xc58   :  { %v678_v54 = vmul.f32 %v1426_v52, %v676_v53  ;;  %v993_v53 = vld [vmem:[%s1826_s6 + $0x18] sm:$0xff]  ;;  %s1529_s6 = smov [#allocation4]  }
 0xc59   :  { %s1100_s29 = sshll.u32 %s1529_s6, 4  ;;  %s1101_s29 = int_to_ptr.vmem [resolvable:$true] %s1100_s29 }
 0xc5a   :  { %680 = vrot.lane.b32.xlu0 %v678_v54, %s1527_s13  ;;  %v1378_v54 = vpack.c.bf16 %v993_v53, %v992_v51  ;;  %s1453_s11 = scalar_lea.vmem %s1101_s29, 128  ;;  %p1458_p1 = scmp.lt.s32.totalorder %s1101_s29, %s1101_s29 }
 0xc5b   :  { %p1454_p0 = scmp.ne.s32.totalorder %s1101_s29, %s1453_s11  ;;  %p1459_p2 = scmp.lt.s32.totalorder %s1453_s11, %s1453_s11 }
 0xc5d   :  { %p1460_p3 = por %p1459_p2, %p1458_p1 }
 0xc5f   :  { %p1461_p4 = pnand %p1460_p3, %p1454_p0 }
 0xccc   :  { %v681_v56 = vpop.permute.xlu0 %680 }
 0xccd   :  { %v683_v57 = vadd.f32 %v681_v56, %v673_v55 }
 0xccf   :  { %1427 = vtanh.f32 %v683_v57 }
 0xcd9   :  { %v1428_v58 = vpop.eup %1427 }
 0xcda   :  { %686 = vrot.lane.b32.xlu1 %v1428_v58, %s1526_s30 }
 0xd4c   :  { %v687_v59 = vpop.permute.xlu1 %686 }
 0xd4d   :  { %v689_v60 = vmul.f32 %v1426_v52, %v687_v59  ;;  %v1375_v52 = vpack.c.bf16 %v991_v50, %v990_v0 }
 0xd4f   :  { %691 = vrot.lane.b32.xlu0 %v689_v60, %s1527_s13 }
 0xdc1   :  { %v692_v61 = vpop.permute.xlu0 %691 }
 0xdc2   :  { %1287 = vmatmul.mubr.msk.f32.vlgmr.msra.gmra.mrb[6].mxu1 %vm187_vm2, %v692_v61 }
 0xdc3   :  { %1370 = vmatpush3.bf16.msra.mxu1 %v1603_v7  ;;  %1308 = vmatprep.mubr.msk.f32.mxu1 %vm1524_vm1, %v1525_v10 }
 0xdc4   :  { %1371 = vmatprep.subr.bf16.mxu1 %v1523_v3 }
 0xdc7   :  { %1373 = vmatpush3.bf16.msra.mxu1 %v1618_v12 }
 0xe95   :  { %v761_v2 = vpop.f32.mrb[6].mxu1 }
 0xe96   :  { %v765_v4 = vadd.f32 %v761_v2, %v168_v63  ;;  %v1288_v5 = vpop.f32.mrb[7].mxu1 }
 0xe98   :  { %1429 = vtanh.f32 %v765_v4  ;;  %v1145_v8 = vmul.f32 -1.442695, %v765_v4 }
 0xe9a   :  { %1431 = vpow2.f32 %v1145_v8 }
 0xea2   :  { %v1430_v6 = vpop.eup %1429 }
 0xea3   :  { %775 = vrot.lane.b32.xlu1 %v1430_v6, %s1526_s30 }
 0xea4   :  { %v1432_v7 = vpop.eup %1431 }
 0xea5   :  { %v769_v9 = vadd.f32 1.0, %v1432_v7 }
 0xea7   :  { %1433 = vrcp.f32 %v769_v9 }
 0xeb1   :  { %v1434_v11 = vpop.eup %1433 }
 0xeb2   :  { %v773_v12 = vmul.f32 %v1434_v11, %v683_v57 }
 0xf15   :  { %v776_v13 = vpop.permute.xlu1 %775 }
 0xf16   :  { %v778_v15 = vmul.f32 %v1434_v11, %v776_v13 }
 0xf18   :  { %780 = vrot.lane.b32.xlu0 %v778_v15, %s1527_s13 }
 0xf8a   :  { %v781_v16 = vpop.permute.xlu0 %780 }
 0xf8b   :  { %v783_v62 = vadd.f32 %v781_v16, %v773_v12 }
 0xf8d   :  { %1435 = vtanh.f32 %v783_v62 }
 0xf97   :  { %v1436_v17 = vpop.eup %1435 }
 0xf98   :  { %786 = vrot.lane.b32.xlu1 %v1436_v17, %s1526_s30 }
0x100a   :  { %v787_v18 = vpop.permute.xlu1 %786 }
0x100b   :  { %v789_v19 = vmul.f32 %v1434_v11, %v787_v18 }
0x100d   :  { %791 = vrot.lane.b32.xlu0 %v789_v19, %s1527_s13 }
0x107f   :  { %v792_v20 = vpop.permute.xlu0 %791 }
0x1080   :  { %1298 = vmatmul.mubr.msk.f32.vlgmr.msra.gmra.mrb[12].mxu0 %vm187_vm2, %v792_v20 }
0x1081   :  { %1319 = vmatprep.mubr.msk.f32.mxu0 %vm1524_vm1, %v1525_v10  ;;  %1376 = vmatpush3.bf16.msra.mxu0 %v1375_v52 }
0x1082   :  { %1377 = vmatprep.subr.bf16.mxu0 %v1523_v3 }
0x1085   :  { %1379 = vmatpush3.bf16.msra.mxu0 %v1378_v54 }
0x1153   :  { %v861_v22 = vpop.f32.mrb[12].mxu0 }
0x1154   :  { %v865_v23 = vadd.f32 %v861_v22, %v173_v21  ;;  %v1299_v24 = vpop.f32.mrb[13].mxu0 }
0x1156   :  { %1437 = vtanh.f32 %v865_v23  ;;  %v1147_v26 = vmul.f32 -1.442695, %v865_v23 }
0x1158   :  { %1439 = vpow2.f32 %v1147_v26 }
0x1160   :  { %v1438_v25 = vpop.eup %1437 }
0x1161   :  { %875 = vrot.lane.b32.xlu1 %v1438_v25, %s1526_s30 }
0x1162   :  { %v1440_v27 = vpop.eup %1439 }
0x1163   :  { %v869_v28 = vadd.f32 1.0, %v1440_v27 }
0x1165   :  { %1441 = vrcp.f32 %v869_v28 }
0x116f   :  { %v1442_v29 = vpop.eup %1441 }
0x1170   :  { %v873_v10 = vmul.f32 %v1442_v29, %v783_v62 }
0x11d3   :  { %v876_v30 = vpop.permute.xlu1 %875 }
0x11d4   :  { %v878_v31 = vmul.f32 %v1442_v29, %v876_v30 }
0x11d6   :  { %880 = vrot.lane.b32.xlu0 %v878_v31, %s1527_s13 }
0x1248   :  { %v881_v32 = vpop.permute.xlu0 %880 }
0x1249   :  { %v883_v1 = vadd.f32 %v881_v32, %v873_v10 }
0x124b   :  { %1443 = vtanh.f32 %v883_v1 }
0x1255   :  { %v1444_v33 = vpop.eup %1443 }
0x1256   :  { %886 = vrot.lane.b32.xlu1 %v1444_v33, %s1526_s30 }
0x12c8   :  { %v887_v34 = vpop.permute.xlu1 %886 }
0x12c9   :  { %v889_v35 = vmul.f32 %v1442_v29, %v887_v34 }
0x12cb   :  { %891 = vrot.lane.b32.xlu0 %v889_v35, %s1527_s13 }
0x133d   :  { %v892_v36 = vpop.permute.xlu0 %891 }
0x133e   :  { %1309 = vmatmul.mubr.msk.f32.vlgmr.msra.gmra.mrb[8].mxu1 %vm187_vm2, %v892_v36 }
0x1411   :  { %v961_v38 = vpop.f32.mrb[8].mxu1 }
0x1412   :  { %v965_v39 = vadd.f32 %v961_v38, %v178_v37  ;;  %v1310_v40 = vpop.f32.mrb[9].mxu1 }
0x1414   :  { %1445 = vtanh.f32 %v965_v39  ;;  %v1149_v42 = vmul.f32 -1.442695, %v965_v39 }
0x1416   :  { %1447 = vpow2.f32 %v1149_v42 }
0x141e   :  { %v1446_v41 = vpop.eup %1445 }
0x141f   :  { %975 = vrot.lane.b32.xlu1 %v1446_v41, %s1526_s30 }
0x1420   :  { %v1448_v43 = vpop.eup %1447 }
0x1421   :  { %v969_v44 = vadd.f32 1.0, %v1448_v43 }
0x1423   :  { %1449 = vrcp.f32 %v969_v44 }
0x142d   :  { %v1450_v45 = vpop.eup %1449 }
0x142e   :  { %v973_v48 = vmul.f32 %v1450_v45, %v883_v1 }
0x1491   :  { %v976_v46 = vpop.permute.xlu1 %975 }
0x1492   :  { %v978_v47 = vmul.f32 %v1450_v45, %v976_v46 }
0x1494   :  { %980 = vrot.lane.b32.xlu0 %v978_v47, %s1527_s13 }
0x1506   :  { %v981_v49 = vpop.permute.xlu0 %980 }
0x1507   :  { %v983_v14 = vadd.f32 %v981_v49, %v973_v48 }
0x1509   :  { %1451 = vtanh.f32 %v983_v14 }
0x1513   :  { %v1452_v55 = vpop.eup %1451 }
0x1514   :  { %986 = vrot.lane.b32.xlu1 %v1452_v55, %s1526_s30 }
0x1518   :  { %1080 = vrot.lane.b32.xlu1 %v983_v14, %s1528_s1 }
0x1586   :  { %v987_v56 = vpop.permute.xlu1 %986 }
0x1587   :  { %v989_v57 = vmul.f32 %v1450_v45, %v987_v56 }
0x1589   :  { %1002 = vrot.lane.b32.xlu0 %v989_v57, %s1527_s13 }
0x158a   :  { %v1081_v58 = vpop.permute.xlu1 %1080 }
0x158b   :  { %1083 = vst.msk [vmem:[#allocation6] sm:$0xff] %vm187_vm2, %v1081_v58 }
0x15fb   :  { %v1003_v59 = vpop.permute.xlu0 %1002 }
0x15fc   :  { %1078 = vst.msk [vmem:[#allocation4] sm:$0xff] %vm187_vm2, %v1003_v59  ;;  %1320 = vmatmul.mubr.msk.f32.vlgmr.msra.gmra.mrb[14].mxu0 %vm187_vm2, %v1003_v59 }
0x15fd   :  { %1464 = shalt.err (!%p1461_p4)
}
0x15fe   :  { %s1465_s13 = scalar_lea.hbm %s1829_s9, 128 }
0x15ff   :  { %p1466_p5 = scmp.ne.s32.totalorder %s1829_s9, %s1465_s13  ;;  %p1469_p6 = scmp.lt.u32.totalorder %s1465_s13, %s1829_s9 }
0x1601   :  { %p1471_p7 = pnand %p1469_p6, %p1466_p5 }
0x1603   :  { %1474 = shalt.err (!%p1471_p7)
}
0x1604   :  { %1103 = dma.vmem_to_hbm [thread:$0]  %s1101_s29, 128, %s1829_s9, [#allocation5]  }
0x1605   :  { %s1530_s18 = smov [#allocation6]  }
0x1606   :  { %s1110_s19 = sshll.u32 %s1530_s18, 4  ;;  %s1111_s19 = int_to_ptr.vmem [resolvable:$true] %s1110_s19 }
0x1607   :  { %s1475_s20 = scalar_lea.vmem %s1111_s19, 128  ;;  %p1480_p9 = scmp.lt.s32.totalorder %s1111_s19, %s1111_s19 }
0x1608   :  { %p1476_p8 = scmp.ne.s32.totalorder %s1111_s19, %s1475_s20  ;;  %p1481_p10 = scmp.lt.s32.totalorder %s1475_s20, %s1475_s20 }
0x160a   :  { %p1482_p11 = por %p1481_p10, %p1480_p9 }
0x160c   :  { %p1483_p12 = pnand %p1482_p11, %p1476_p8 }
0x160e   :  { %1486 = shalt.err (!%p1483_p12)
}
0x160f   :  { %s1487_s3 = scalar_lea.hbm %s1830_s10, 128 }
0x1610   :  { %p1488_p13 = scmp.ne.s32.totalorder %s1830_s10, %s1487_s3  ;;  %p1491_p0 = scmp.lt.u32.totalorder %s1487_s3, %s1830_s10 }
0x1612   :  { %p1493_p1 = pnand %p1491_p0, %p1488_p13 }
0x1614   :  { %1496 = shalt.err (!%p1493_p1)
}
0x1615   :  { %1113 = dma.vmem_to_hbm [thread:$0]  %s1111_s19, 128, %s1830_s10, [#allocation5]   ;;  %v1150_v3 = vld [vmem:[%s1827_s7] ss:$0 sm:$0xff] }
0x1616   :  { %s1531_s28 = smov [#allocation2]  }
0x1617   :  { %s1090_s1 = sshll.u32 %s1531_s28, 4  ;;  %s1091_s1 = int_to_ptr.vmem [resolvable:$true] %s1090_s1 }
0x1618   :  { %s1497_s6 = scalar_lea.vmem %s1091_s1, 128  ;;  %p1502_p3 = scmp.lt.s32.totalorder %s1091_s1, %s1091_s1 }
0x1619   :  { %p1498_p2 = scmp.ne.s32.totalorder %s1091_s1, %s1497_s6  ;;  %p1503_p4 = scmp.lt.s32.totalorder %s1497_s6, %s1497_s6 }
0x161b   :  { %p1504_p5 = por %p1503_p4, %p1502_p3 }
0x161d   :  { %p1505_p6 = pnand %p1504_p5, %p1498_p2 }
0x16cf   :  { %v1072_v60 = vpop.f32.mrb[14].mxu0 }
0x16d0   :  { %v1073_v61 = vadd.f32 %v1150_v3, %v1072_v60  ;;  %v1321_v63 = vpop.f32.mrb[15].mxu0 }
0x16d2   :  { %1076 = vst.msk [vmem:[#allocation2] sm:$0xff] %vm51_vm0, %v1073_v61 }
0x16d3   :  { %1508 = shalt.err (!%p1505_p6)
}
0x16d4   :  { %s1509_s11 = scalar_lea.hbm %s1828_s8, 128 }
0x16d5   :  { %p1510_p7 = scmp.ne.s32.totalorder %s1828_s8, %s1509_s11  ;;  %p1513_p8 = scmp.lt.u32.totalorder %s1509_s11, %s1828_s8 }
0x16d7   :  { %p1515_p9 = pnand %p1513_p8, %p1510_p7 }
0x16d9   :  { %1518 = shalt.err (!%p1515_p9)
}
0x16da   :  { %1093 = dma.vmem_to_hbm [thread:$0]  %s1091_s1, 128, %s1828_s8, [#allocation3]  }
0x16db   :  { %1519 = dma.done.wait [#allocation3], 128  }
0x16dc   :  { %1520 = vsyncadd [#allocation3], 4294967168 }
0x16dd   :  { %1521 = dma.done.wait [#allocation5], 256  }
0x16de   :  { %1522 = vsyncadd [#allocation5], 4294967040 }
0x16df   :  { %1123 = vsyncpa [#allocation3], 1 }
0x16e0   :  { %1124 = vsyncpa [#allocation5], 1 }

</bundles_post_ra>
